<compile_context>
chip_gen: v7x
topology: tpu7x:2x2x1
jax: 0.10.0
libtpu: 0.0.40
codegen_flags: <defaults>
</compile_context>

<pallas_src>
import math

import jax
import jax.numpy as jnp
from jax.experimental import pallas as pl
from jax.experimental.pallas import tpu as pltpu


def _qnet_kernel(x_ref, w1_ref, b1_ref, w2_ref, b2_ref, w3_ref, b3_ref, o_ref):
    """Batch-on-lanes layout: activations are (features, batch_tile)."""
    tb = x_ref.shape[-1]

    def layer(h, w, b, *, relu):
        # h: (K, tb)   w: (n_out, K)   b: (n_out, 1)   ->   (n_out, tb)
        # VPU broadcast-MAC: K outer-product accumulates, no MXU involvement.
        n_out, k_dim = w.shape
        acc = jnp.broadcast_to(b, (n_out, tb))
        for k in range(k_dim):                      # static unroll, K <= 8
            acc = acc + w[:, k:k + 1] * h[k:k + 1, :]
        return jnp.maximum(acc, 0.0) if relu else acc

    h1 = layer(x_ref[...], w1_ref[...], b1_ref[...], relu=True)     # (8, tb)
    h2 = layer(h1, w2_ref[...], b2_ref[...], relu=True)             # (8, tb)
    out = layer(h2, w3_ref[...], b3_ref[...], relu=False)           # (A, tb)
    o_ref[...] = out.astype(o_ref.dtype)


def _pick_batch_tile(batch, block_b):
    """Batch tile on the lane axis.

    * tiny batch: single full-array block (no 128-multiple requirement).
    * otherwise: multiple of 128, capped at block_b, and capped at
      round_up(ceil(B/2), 128) so the grid has >= 2 steps and
      dimension_semantics=("parallel",) can shard across both v7x TensorCores.
    """
    if batch <= 256:
        return batch
    half_rounded = pl.cdiv(pl.cdiv(batch, 2), 128) * 128
    return min(block_b, half_rounded)


def qnetwork_apply_t(xt, params, *, block_b=32768):
    """Fast path (no boundary transposes).

    xt: (state_size, B) float32, state_size <= 8 (features x batch).
    Returns q^T of shape (action_size, B) float32; argmax over axis 0 gives
    the greedy action per batch element.
    """
    w1, b1, w2, b2, w3, b3 = params
    S, B = xt.shape
    if S > 8:
        raise ValueError(f"state_size must be <= 8, got {S}")
    A = w3.shape[0]

    # Exact equivalent of the PyTorch zero-pad of x to 8 features: padded
    # feature columns contribute nothing, so contract against w1[:, :S].
    w1s = w1[:, :S]                                  # (8, S), tiny op

    tb = _pick_batch_tile(B, block_b)
    grid = (pl.cdiv(B, tb),)
    const = lambda i: (0, 0)                         # weights/biases resident

    return pl.pallas_call(
        _qnet_kernel,
        out_shape=jax.ShapeDtypeStruct((A, B), jnp.float32),
        grid=grid,
        in_specs=[
            pl.BlockSpec((S, tb), lambda i: (0, i)),     # x^T, tiled on batch
            pl.BlockSpec((8, S), const),                 # w1[:, :S]
            pl.BlockSpec((8, 1), const),                 # b1
            pl.BlockSpec((8, 8), const),                 # w2
            pl.BlockSpec((8, 1), const),                 # b2
            pl.BlockSpec((A, 8), const),                 # w3
            pl.BlockSpec((A, 1), const),                 # b3
        ],
        out_specs=pl.BlockSpec((A, tb), lambda i: (0, i)),
        compiler_params=pltpu.CompilerParams(
            dimension_semantics=("parallel",)),          # megacore on v7x
    )(xt, w1s, b1, w2, b2, w3, b3)


def _fused_small(x, params):
    """Pure-JAX fused path for tiny batches (act()-sized): one XLA fusion beats
    the fixed pallas_call cost at B of a few hundred or less."""
    w1, b1, w2, b2, w3, b3 = params
    S = x.shape[1]
    p = jax.lax.Precision.HIGHEST
    h = jnp.maximum(jnp.dot(x, w1[:, :S].T, precision=p) + b1[:, 0], 0.0)
    h = jnp.maximum(jnp.dot(h, w2.T, precision=p) + b2[:, 0], 0.0)
    return jnp.dot(h, w3.T, precision=p) + b3[:, 0]


def qnetwork_forward(x, params, *, block_b=32768, small_batch=1024):
    """PyTorch-layout compatibility wrapper: x (B, state_size) -> (B, action_size).

    For B < small_batch uses the fused pure-JAX fast path.  For larger B it
    pays one transpose on each side of the kernel; callers that can keep their
    activations in (features, batch) layout should use qnetwork_apply_t and
    avoid the transposes entirely.
    """
    B, S = x.shape
    if S > 8:
        raise ValueError(f"state_size must be <= 8, got {S}")
    if B < small_batch:
        return _fused_small(x, params)
    return qnetwork_apply_t(x.T, params, block_b=block_b).T


def act(state, params):
    """Greedy action for a single state, mirroring QNetwork.act."""
    q = _fused_small(jnp.reshape(state, (1, -1)), params)
    # TODO(synk): torch's .item() is a host-side sync; here we just return the
    # device argmax converted to a Python int at the call site.
    return int(jnp.argmax(q, axis=1)[0])


def init_qnetwork_params(key, action_size):
    """Matches torch.nn.Linear default init (uniform +-1/sqrt(fan_in)).

    Weights in torch layout (out_features, in_features); biases as
    (out_features, 1) so they broadcast over the lane (batch) axis.
    """
    keys = jax.random.split(key, 6)

    def linear(kw, kb, fan_in, fan_out):
        bound = 1.0 / math.sqrt(fan_in)
        w = jax.random.uniform(kw, (fan_out, fan_in), jnp.float32, -bound, bound)
        b = jax.random.uniform(kb, (fan_out, 1), jnp.float32, -bound, bound)
        return w, b

    w1, b1 = linear(keys[0], keys[1], 8, 8)
    w2, b2 = linear(keys[2], keys[3], 8, 8)
    w3, b3 = linear(keys[4], keys[5], 8, action_size)
    return (w1, b1, w2, b2, w3, b3)


def _reference(x, params):
    """Pure-JAX reference matching the PyTorch forward (zero-pad features to 8)."""
    w1, b1, w2, b2, w3, b3 = params
    B, S = x.shape
    xp = jnp.pad(x, ((0, 0), (0, 8 - S))) if S != 8 else x
    p = jax.lax.Precision.HIGHEST
    h = jnp.maximum(jnp.dot(xp, w1.T, precision=p) + b1[:, 0], 0.0)
    h = jnp.maximum(jnp.dot(h, w2.T, precision=p) + b2[:, 0], 0.0)
    return jnp.dot(h, w3.T, precision=p) + b3[:, 0]


if __name__ == "__main__":
    key = jax.random.PRNGKey(0)
    k_param, k_x1, k_x2, k_x3 = jax.random.split(key, 4)

    state_size = 6       # != 8 to exercise the feature-slice (pad-equivalent) path
    action_size = 4
    params = init_qnetwork_params(k_param, action_size)

    # Case 1: tiny batch through the transposed (zero-transpose) kernel path.
    x_small = jax.random.normal(k_x1, (2, state_size), jnp.float32)
    qt_small = jax.block_until_ready(qnetwork_apply_t(x_small.T, params))
    assert qt_small.shape == (action_size, 2)
    assert jnp.allclose(qt_small.T, _reference(x_small, params), atol=1e-4, rtol=1e-4)

    # Case 2: multi-block grid with a ragged last block (tile picker gives
    # tb=256 -> 2 grid steps, exercising the parallel grid + masked writeback).
    x_big = jax.random.normal(k_x2, (300, state_size), jnp.float32)
    qt_big = jax.block_until_ready(qnetwork_apply_t(x_big.T, params))
    assert qt_big.shape == (action_size, 300)
    assert jnp.allclose(qt_big.T, _reference(x_big, params), atol=1e-4, rtol=1e-4)

    # Case 3: PyTorch-layout wrapper, kernel path (B >= small_batch threshold).
    x_med = jax.random.normal(k_x3, (4096, state_size), jnp.float32)
    q_med = jax.block_until_ready(qnetwork_forward(x_med, params))
    assert q_med.shape == (4096, action_size)
    assert jnp.allclose(q_med, _reference(x_med, params), atol=1e-4, rtol=1e-4)

    # Case 4: PyTorch-layout wrapper, small-batch fused fast path + act().
    q_small = jax.block_until_ready(qnetwork_forward(x_small, params))
    assert q_small.shape == (2, action_size)
    assert jnp.allclose(q_small, _reference(x_small, params), atol=1e-4, rtol=1e-4)
    a = act(x_small[0], params)
    assert 0 <= a < action_size

    print("KERNEL_OK")
</pallas_src>

<mosaic_0001>
module attributes {stable_mosaic.version = 11 : i64} {
  func.func @_qnet_kernel(%arg0: i32, %arg1: memref<6x2xf32, #tpu.memory_space<vmem>>, %arg2: memref<8x6xf32, #tpu.memory_space<vmem>>, %arg3: memref<8x1xf32, #tpu.memory_space<vmem>>, %arg4: memref<8x8xf32, #tpu.memory_space<vmem>>, %arg5: memref<8x1xf32, #tpu.memory_space<vmem>>, %arg6: memref<4x8xf32, #tpu.memory_space<vmem>>, %arg7: memref<4x1xf32, #tpu.memory_space<vmem>>, %arg8: memref<4x2xf32, #tpu.memory_space<vmem>>) attributes {dimension_semantics = [#tpu.dimension_semantics<parallel>], iteration_bounds = array<i64: 1>, scalar_prefetch = 0 : i64, scratch_operands = 0 : i64, tpu.core_type = #tpu.core_type<tc>, window_params = [{transform_indices = @transform_0, window_bounds = array<i64: 6, 2>}, {pipeline_mode = #tpu.pipeline_mode<synchronous>, transform_indices = @transform_1, window_bounds = array<i64: 8, 6>}, {pipeline_mode = #tpu.pipeline_mode<synchronous>, transform_indices = @transform_2, window_bounds = array<i64: 8, 1>}, {pipeline_mode = #tpu.pipeline_mode<synchronous>, transform_indices = @transform_3, window_bounds = array<i64: 8, 8>}, {pipeline_mode = #tpu.pipeline_mode<synchronous>, transform_indices = @transform_4, window_bounds = array<i64: 8, 1>}, {pipeline_mode = #tpu.pipeline_mode<synchronous>, transform_indices = @transform_5, window_bounds = array<i64: 4, 8>}, {pipeline_mode = #tpu.pipeline_mode<synchronous>, transform_indices = @transform_6, window_bounds = array<i64: 4, 1>}, {transform_indices = @transform_7, window_bounds = array<i64: 4, 2>}]} {
    %c0 = arith.constant 0 : index
    %c0_0 = arith.constant 0 : index
    %0 = vector.load %arg1[%c0, %c0_0] : memref<6x2xf32, #tpu.memory_space<vmem>>, vector<6x2xf32>
    %c0_1 = arith.constant 0 : index
    %c0_2 = arith.constant 0 : index
    %1 = vector.load %arg2[%c0_1, %c0_2] : memref<8x6xf32, #tpu.memory_space<vmem>>, vector<8x6xf32>
    %c0_3 = arith.constant 0 : index
    %c0_4 = arith.constant 0 : index
    %2 = vector.load %arg3[%c0_3, %c0_4] : memref<8x1xf32, #tpu.memory_space<vmem>>, vector<8x1xf32>
    %3 = vector.shape_cast %2 : vector<8x1xf32> to vector<8x1xf32>
    %4 = vector.broadcast %3 : vector<8x1xf32> to vector<8x2xf32>
    %5 = vector.extract_strided_slice %1 {offsets = [0, 0], sizes = [8, 1], strides = [1, 1]} : vector<8x6xf32> to vector<8x1xf32>
    %6 = vector.extract_strided_slice %0 {offsets = [0, 0], sizes = [1, 2], strides = [1, 1]} : vector<6x2xf32> to vector<1x2xf32>
    %7 = vector.broadcast %5 : vector<8x1xf32> to vector<8x2xf32>
    %8 = vector.broadcast %6 : vector<1x2xf32> to vector<8x2xf32>
    %9 = arith.mulf %7, %8 : vector<8x2xf32>
    %10 = arith.addf %4, %9 : vector<8x2xf32>
    %11 = vector.extract_strided_slice %1 {offsets = [0, 1], sizes = [8, 1], strides = [1, 1]} : vector<8x6xf32> to vector<8x1xf32>
    %12 = vector.extract_strided_slice %0 {offsets = [1, 0], sizes = [1, 2], strides = [1, 1]} : vector<6x2xf32> to vector<1x2xf32>
    %13 = vector.broadcast %11 : vector<8x1xf32> to vector<8x2xf32>
    %14 = vector.broadcast %12 : vector<1x2xf32> to vector<8x2xf32>
    %15 = arith.mulf %13, %14 : vector<8x2xf32>
    %16 = arith.addf %10, %15 : vector<8x2xf32>
    %17 = vector.extract_strided_slice %1 {offsets = [0, 2], sizes = [8, 1], strides = [1, 1]} : vector<8x6xf32> to vector<8x1xf32>
    %18 = vector.extract_strided_slice %0 {offsets = [2, 0], sizes = [1, 2], strides = [1, 1]} : vector<6x2xf32> to vector<1x2xf32>
    %19 = vector.broadcast %17 : vector<8x1xf32> to vector<8x2xf32>
    %20 = vector.broadcast %18 : vector<1x2xf32> to vector<8x2xf32>
    %21 = arith.mulf %19, %20 : vector<8x2xf32>
    %22 = arith.addf %16, %21 : vector<8x2xf32>
    %23 = vector.extract_strided_slice %1 {offsets = [0, 3], sizes = [8, 1], strides = [1, 1]} : vector<8x6xf32> to vector<8x1xf32>
    %24 = vector.extract_strided_slice %0 {offsets = [3, 0], sizes = [1, 2], strides = [1, 1]} : vector<6x2xf32> to vector<1x2xf32>
    %25 = vector.broadcast %23 : vector<8x1xf32> to vector<8x2xf32>
    %26 = vector.broadcast %24 : vector<1x2xf32> to vector<8x2xf32>
    %27 = arith.mulf %25, %26 : vector<8x2xf32>
    %28 = arith.addf %22, %27 : vector<8x2xf32>
    %29 = vector.extract_strided_slice %1 {offsets = [0, 4], sizes = [8, 1], strides = [1, 1]} : vector<8x6xf32> to vector<8x1xf32>
    %30 = vector.extract_strided_slice %0 {offsets = [4, 0], sizes = [1, 2], strides = [1, 1]} : vector<6x2xf32> to vector<1x2xf32>
    %31 = vector.broadcast %29 : vector<8x1xf32> to vector<8x2xf32>
    %32 = vector.broadcast %30 : vector<1x2xf32> to vector<8x2xf32>
    %33 = arith.mulf %31, %32 : vector<8x2xf32>
    %34 = arith.addf %28, %33 : vector<8x2xf32>
    %35 = vector.extract_strided_slice %1 {offsets = [0, 5], sizes = [8, 1], strides = [1, 1]} : vector<8x6xf32> to vector<8x1xf32>
    %36 = vector.extract_strided_slice %0 {offsets = [5, 0], sizes = [1, 2], strides = [1, 1]} : vector<6x2xf32> to vector<1x2xf32>
    %37 = vector.broadcast %35 : vector<8x1xf32> to vector<8x2xf32>
    %38 = vector.broadcast %36 : vector<1x2xf32> to vector<8x2xf32>
    %39 = arith.mulf %37, %38 : vector<8x2xf32>
    %40 = arith.addf %34, %39 : vector<8x2xf32>
    %cst = arith.constant 0.000000e+00 : f32
    %41 = vector.broadcast %cst : f32 to vector<8x2xf32>
    %42 = arith.maximumf %40, %41 : vector<8x2xf32>
    %c0_5 = arith.constant 0 : index
    %c0_6 = arith.constant 0 : index
    %43 = vector.load %arg4[%c0_5, %c0_6] : memref<8x8xf32, #tpu.memory_space<vmem>>, vector<8x8xf32>
    %c0_7 = arith.constant 0 : index
    %c0_8 = arith.constant 0 : index
    %44 = vector.load %arg5[%c0_7, %c0_8] : memref<8x1xf32, #tpu.memory_space<vmem>>, vector<8x1xf32>
    %45 = vector.shape_cast %44 : vector<8x1xf32> to vector<8x1xf32>
    %46 = vector.broadcast %45 : vector<8x1xf32> to vector<8x2xf32>
    %47 = vector.extract_strided_slice %43 {offsets = [0, 0], sizes = [8, 1], strides = [1, 1]} : vector<8x8xf32> to vector<8x1xf32>
    %48 = vector.extract_strided_slice %42 {offsets = [0, 0], sizes = [1, 2], strides = [1, 1]} : vector<8x2xf32> to vector<1x2xf32>
    %49 = vector.broadcast %47 : vector<8x1xf32> to vector<8x2xf32>
    %50 = vector.broadcast %48 : vector<1x2xf32> to vector<8x2xf32>
    %51 = arith.mulf %49, %50 : vector<8x2xf32>
    %52 = arith.addf %46, %51 : vector<8x2xf32>
    %53 = vector.extract_strided_slice %43 {offsets = [0, 1], sizes = [8, 1], strides = [1, 1]} : vector<8x8xf32> to vector<8x1xf32>
    %54 = vector.extract_strided_slice %42 {offsets = [1, 0], sizes = [1, 2], strides = [1, 1]} : vector<8x2xf32> to vector<1x2xf32>
    %55 = vector.broadcast %53 : vector<8x1xf32> to vector<8x2xf32>
    %56 = vector.broadcast %54 : vector<1x2xf32> to vector<8x2xf32>
    %57 = arith.mulf %55, %56 : vector<8x2xf32>
    %58 = arith.addf %52, %57 : vector<8x2xf32>
    %59 = vector.extract_strided_slice %43 {offsets = [0, 2], sizes = [8, 1], strides = [1, 1]} : vector<8x8xf32> to vector<8x1xf32>
    %60 = vector.extract_strided_slice %42 {offsets = [2, 0], sizes = [1, 2], strides = [1, 1]} : vector<8x2xf32> to vector<1x2xf32>
    %61 = vector.broadcast %59 : vector<8x1xf32> to vector<8x2xf32>
    %62 = vector.broadcast %60 : vector<1x2xf32> to vector<8x2xf32>
    %63 = arith.mulf %61, %62 : vector<8x2xf32>
    %64 = arith.addf %58, %63 : vector<8x2xf32>
    %65 = vector.extract_strided_slice %43 {offsets = [0, 3], sizes = [8, 1], strides = [1, 1]} : vector<8x8xf32> to vector<8x1xf32>
    %66 = vector.extract_strided_slice %42 {offsets = [3, 0], sizes = [1, 2], strides = [1, 1]} : vector<8x2xf32> to vector<1x2xf32>
    %67 = vector.broadcast %65 : vector<8x1xf32> to vector<8x2xf32>
    %68 = vector.broadcast %66 : vector<1x2xf32> to vector<8x2xf32>
    %69 = arith.mulf %67, %68 : vector<8x2xf32>
    %70 = arith.addf %64, %69 : vector<8x2xf32>
    %71 = vector.extract_strided_slice %43 {offsets = [0, 4], sizes = [8, 1], strides = [1, 1]} : vector<8x8xf32> to vector<8x1xf32>
    %72 = vector.extract_strided_slice %42 {offsets = [4, 0], sizes = [1, 2], strides = [1, 1]} : vector<8x2xf32> to vector<1x2xf32>
    %73 = vector.broadcast %71 : vector<8x1xf32> to vector<8x2xf32>
    %74 = vector.broadcast %72 : vector<1x2xf32> to vector<8x2xf32>
    %75 = arith.mulf %73, %74 : vector<8x2xf32>
    %76 = arith.addf %70, %75 : vector<8x2xf32>
    %77 = vector.extract_strided_slice %43 {offsets = [0, 5], sizes = [8, 1], strides = [1, 1]} : vector<8x8xf32> to vector<8x1xf32>
    %78 = vector.extract_strided_slice %42 {offsets = [5, 0], sizes = [1, 2], strides = [1, 1]} : vector<8x2xf32> to vector<1x2xf32>
    %79 = vector.broadcast %77 : vector<8x1xf32> to vector<8x2xf32>
    %80 = vector.broadcast %78 : vector<1x2xf32> to vector<8x2xf32>
    %81 = arith.mulf %79, %80 : vector<8x2xf32>
    %82 = arith.addf %76, %81 : vector<8x2xf32>
    %83 = vector.extract_strided_slice %43 {offsets = [0, 6], sizes = [8, 1], strides = [1, 1]} : vector<8x8xf32> to vector<8x1xf32>
    %84 = vector.extract_strided_slice %42 {offsets = [6, 0], sizes = [1, 2], strides = [1, 1]} : vector<8x2xf32> to vector<1x2xf32>
    %85 = vector.broadcast %83 : vector<8x1xf32> to vector<8x2xf32>
    %86 = vector.broadcast %84 : vector<1x2xf32> to vector<8x2xf32>
    %87 = arith.mulf %85, %86 : vector<8x2xf32>
    %88 = arith.addf %82, %87 : vector<8x2xf32>
    %89 = vector.extract_strided_slice %43 {offsets = [0, 7], sizes = [8, 1], strides = [1, 1]} : vector<8x8xf32> to vector<8x1xf32>
    %90 = vector.extract_strided_slice %42 {offsets = [7, 0], sizes = [1, 2], strides = [1, 1]} : vector<8x2xf32> to vector<1x2xf32>
    %91 = vector.broadcast %89 : vector<8x1xf32> to vector<8x2xf32>
    %92 = vector.broadcast %90 : vector<1x2xf32> to vector<8x2xf32>
    %93 = arith.mulf %91, %92 : vector<8x2xf32>
    %94 = arith.addf %88, %93 : vector<8x2xf32>
    %cst_9 = arith.constant 0.000000e+00 : f32
    %95 = vector.broadcast %cst_9 : f32 to vector<8x2xf32>
    %96 = arith.maximumf %94, %95 : vector<8x2xf32>
    %c0_10 = arith.constant 0 : index
    %c0_11 = arith.constant 0 : index
    %97 = vector.load %arg6[%c0_10, %c0_11] : memref<4x8xf32, #tpu.memory_space<vmem>>, vector<4x8xf32>
    %c0_12 = arith.constant 0 : index
    %c0_13 = arith.constant 0 : index
    %98 = vector.load %arg7[%c0_12, %c0_13] : memref<4x1xf32, #tpu.memory_space<vmem>>, vector<4x1xf32>
    %99 = vector.shape_cast %98 : vector<4x1xf32> to vector<4x1xf32>
    %100 = vector.broadcast %99 : vector<4x1xf32> to vector<4x2xf32>
    %101 = vector.extract_strided_slice %97 {offsets = [0, 0], sizes = [4, 1], strides = [1, 1]} : vector<4x8xf32> to vector<4x1xf32>
    %102 = vector.extract_strided_slice %96 {offsets = [0, 0], sizes = [1, 2], strides = [1, 1]} : vector<8x2xf32> to vector<1x2xf32>
    %103 = vector.broadcast %101 : vector<4x1xf32> to vector<4x2xf32>
    %104 = vector.broadcast %102 : vector<1x2xf32> to vector<4x2xf32>
    %105 = arith.mulf %103, %104 : vector<4x2xf32>
    %106 = arith.addf %100, %105 : vector<4x2xf32>
    %107 = vector.extract_strided_slice %97 {offsets = [0, 1], sizes = [4, 1], strides = [1, 1]} : vector<4x8xf32> to vector<4x1xf32>
    %108 = vector.extract_strided_slice %96 {offsets = [1, 0], sizes = [1, 2], strides = [1, 1]} : vector<8x2xf32> to vector<1x2xf32>
    %109 = vector.broadcast %107 : vector<4x1xf32> to vector<4x2xf32>
    %110 = vector.broadcast %108 : vector<1x2xf32> to vector<4x2xf32>
    %111 = arith.mulf %109, %110 : vector<4x2xf32>
    %112 = arith.addf %106, %111 : vector<4x2xf32>
    %113 = vector.extract_strided_slice %97 {offsets = [0, 2], sizes = [4, 1], strides = [1, 1]} : vector<4x8xf32> to vector<4x1xf32>
    %114 = vector.extract_strided_slice %96 {offsets = [2, 0], sizes = [1, 2], strides = [1, 1]} : vector<8x2xf32> to vector<1x2xf32>
    %115 = vector.broadcast %113 : vector<4x1xf32> to vector<4x2xf32>
    %116 = vector.broadcast %114 : vector<1x2xf32> to vector<4x2xf32>
    %117 = arith.mulf %115, %116 : vector<4x2xf32>
    %118 = arith.addf %112, %117 : vector<4x2xf32>
    %119 = vector.extract_strided_slice %97 {offsets = [0, 3], sizes = [4, 1], strides = [1, 1]} : vector<4x8xf32> to vector<4x1xf32>
    %120 = vector.extract_strided_slice %96 {offsets = [3, 0], sizes = [1, 2], strides = [1, 1]} : vector<8x2xf32> to vector<1x2xf32>
    %121 = vector.broadcast %119 : vector<4x1xf32> to vector<4x2xf32>
    %122 = vector.broadcast %120 : vector<1x2xf32> to vector<4x2xf32>
    %123 = arith.mulf %121, %122 : vector<4x2xf32>
    %124 = arith.addf %118, %123 : vector<4x2xf32>
    %125 = vector.extract_strided_slice %97 {offsets = [0, 4], sizes = [4, 1], strides = [1, 1]} : vector<4x8xf32> to vector<4x1xf32>
    %126 = vector.extract_strided_slice %96 {offsets = [4, 0], sizes = [1, 2], strides = [1, 1]} : vector<8x2xf32> to vector<1x2xf32>
    %127 = vector.broadcast %125 : vector<4x1xf32> to vector<4x2xf32>
    %128 = vector.broadcast %126 : vector<1x2xf32> to vector<4x2xf32>
    %129 = arith.mulf %127, %128 : vector<4x2xf32>
    %130 = arith.addf %124, %129 : vector<4x2xf32>
    %131 = vector.extract_strided_slice %97 {offsets = [0, 5], sizes = [4, 1], strides = [1, 1]} : vector<4x8xf32> to vector<4x1xf32>
    %132 = vector.extract_strided_slice %96 {offsets = [5, 0], sizes = [1, 2], strides = [1, 1]} : vector<8x2xf32> to vector<1x2xf32>
    %133 = vector.broadcast %131 : vector<4x1xf32> to vector<4x2xf32>
    %134 = vector.broadcast %132 : vector<1x2xf32> to vector<4x2xf32>
    %135 = arith.mulf %133, %134 : vector<4x2xf32>
    %136 = arith.addf %130, %135 : vector<4x2xf32>
    %137 = vector.extract_strided_slice %97 {offsets = [0, 6], sizes = [4, 1], strides = [1, 1]} : vector<4x8xf32> to vector<4x1xf32>
    %138 = vector.extract_strided_slice %96 {offsets = [6, 0], sizes = [1, 2], strides = [1, 1]} : vector<8x2xf32> to vector<1x2xf32>
    %139 = vector.broadcast %137 : vector<4x1xf32> to vector<4x2xf32>
    %140 = vector.broadcast %138 : vector<1x2xf32> to vector<4x2xf32>
    %141 = arith.mulf %139, %140 : vector<4x2xf32>
    %142 = arith.addf %136, %141 : vector<4x2xf32>
    %143 = vector.extract_strided_slice %97 {offsets = [0, 7], sizes = [4, 1], strides = [1, 1]} : vector<4x8xf32> to vector<4x1xf32>
    %144 = vector.extract_strided_slice %96 {offsets = [7, 0], sizes = [1, 2], strides = [1, 1]} : vector<8x2xf32> to vector<1x2xf32>
    %145 = vector.broadcast %143 : vector<4x1xf32> to vector<4x2xf32>
    %146 = vector.broadcast %144 : vector<1x2xf32> to vector<4x2xf32>
    %147 = arith.mulf %145, %146 : vector<4x2xf32>
    %148 = arith.addf %142, %147 : vector<4x2xf32>
    %c0_14 = arith.constant 0 : index
    %c0_15 = arith.constant 0 : index
    %149 = vector.load %arg8[%c0_14, %c0_15] : memref<4x2xf32, #tpu.memory_space<vmem>>, vector<4x2xf32>
    tpu.vector_store %arg8[%c0_14, %c0_15], %148 {strides = array<i32>} : memref<4x2xf32, #tpu.memory_space<vmem>>, vector<4x2xf32>,
    return
  }
  func.func @transform_0(%arg0: i32) -> (i32, i32) {
    %c0_i32 = arith.constant 0 : i32
    %c0_i32_0 = arith.constant 0 : i32
    return %c0_i32, %arg0 : i32, i32
  }
  func.func @transform_1(%arg0: i32) -> (i32, i32) {
    %c0_i32 = arith.constant 0 : i32
    %c0_i32_0 = arith.constant 0 : i32
    %c0_i32_1 = arith.constant 0 : i32
    return %c0_i32, %c0_i32_0 : i32, i32
  }
  func.func @transform_2(%arg0: i32) -> (i32, i32) {
    %c0_i32 = arith.constant 0 : i32
    %c0_i32_0 = arith.constant 0 : i32
    %c0_i32_1 = arith.constant 0 : i32
    return %c0_i32, %c0_i32_0 : i32, i32
  }
  func.func @transform_3(%arg0: i32) -> (i32, i32) {
    %c0_i32 = arith.constant 0 : i32
    %c0_i32_0 = arith.constant 0 : i32
    %c0_i32_1 = arith.constant 0 : i32
    return %c0_i32, %c0_i32_0 : i32, i32
  }
  func.func @transform_4(%arg0: i32) -> (i32, i32) {
    %c0_i32 = arith.constant 0 : i32
    %c0_i32_0 = arith.constant 0 : i32
    %c0_i32_1 = arith.constant 0 : i32
    return %c0_i32, %c0_i32_0 : i32, i32
  }
  func.func @transform_5(%arg0: i32) -> (i32, i32) {
    %c0_i32 = arith.constant 0 : i32
    %c0_i32_0 = arith.constant 0 : i32
    %c0_i32_1 = arith.constant 0 : i32
    return %c0_i32, %c0_i32_0 : i32, i32
  }
  func.func @transform_6(%arg0: i32) -> (i32, i32) {
    %c0_i32 = arith.constant 0 : i32
    %c0_i32_0 = arith.constant 0 : i32
    %c0_i32_1 = arith.constant 0 : i32
    return %c0_i32, %c0_i32_0 : i32, i32
  }
  func.func @transform_7(%arg0: i32) -> (i32, i32) {
    %c0_i32 = arith.constant 0 : i32
    %c0_i32_0 = arith.constant 0 : i32
    return %c0_i32, %arg0 : i32, i32
  }
}

</mosaic_0001>

<bundles_post_ra>
// kernel: tpu_custom_call.1
= control target key start
LH: loop header
LB: loop body
LE: loop exit
PB: predicated region body
PF: predicated region fallthrough
CT: control target
= control target key end

     0   :  { %v312_v0 = vmov 1   ;;  %v313_v1 = vmov 0   ;;  %v314_v4 = vmov 2   ;;  %v315_v5 = vmov 3   ;;  %s424_s1 = inlined_call_operand.vmem [shape: f32[8,6], index: 1, kind: input, shape index: {}]   ;;  %s425_s2 = inlined_call_operand.vmem [shape: f32[8,1], index: 2, kind: input, shape index: {}]   ;;  %s426_s3 = inlined_call_operand.vmem [shape: f32[8,8], index: 3, kind: input, shape index: {}]   ;;  %s427_s4 = inlined_call_operand.vmem [shape: f32[8,1], index: 4, kind: input, shape index: {}]   ;;  %s428_s5 = inlined_call_operand.vmem [shape: f32[4,8], index: 5, kind: input, shape index: {}]   ;;  %s429_s6 = inlined_call_operand.vmem [shape: f32[4,1], index: 6, kind: input, shape index: {}]   ;;  %s430_s0 = inlined_call_operand.vmem [shape: f32[6,2], index: 0, kind: input, shape index: {}]   ;;  %s431_s7 = inlined_call_operand.vmem [shape: f32[4,2], index: 7, kind: output, shape index: {}]  }
   0x1   :  { %288 = vset.pattern.permute.xlu1 %v312_v0  ;;  %287 = vset.pattern.permute.xlu0 %v313_v1  ;;  %v27_v2 = vld [vmem:[%s424_s1] sm:$0xff]  ;;  %v316_v6 = vmov 4   ;;  %v317_v8 = vmov 5   ;;  %v318_v11 = vmov 6   ;;  %v319_v12 = vmov 7  }
   0x2   :  { %46 = vperm.xlu1 %288, %v27_v2   ;;  %36 = vperm.xlu0 %287, %v27_v2   ;;  %v28_v3 = vld [vmem:[%s425_s2] sm:$0xff]  ;;  %v39_v14 = vlaneseq  ;;  %vm273_vm0 = vcmask 11264  }
   0x3   :  { %v96_v7 = vld [vmem:[%s426_s3] sm:$0xff] }
   0x4   :  { %v97_v9 = vld [vmem:[%s427_s4] sm:$0xff]  ;;  %v378_v15 = vshrl.u32 %v39_v14, 7 }
   0x5   :  { %v185_v10 = vld [vmem:[%s428_s5] sm:$0xf] }
   0x6   :  { %289 = vset.pattern.permute.xlu1 %v314_v4  ;;  %31 = vperm.xlu0 %287, %v28_v3   ;;  %v186_v13 = vld [vmem:[%s429_s6] sm:$0xf]  ;;  %v381_v16 = vsub.s32 0, %v378_v15  ;;  %v387_v18 = vsub.s32 1, %v378_v15  ;;  %v391_v20 = vsub.s32 2, %v378_v15  ;;  %v396_v26 = vsub.s32 3, %v378_v15 }
   0x7   :  { %56 = vperm.xlu1 %289, %v27_v2   ;;  %v26_v17 = vld [vmem:[%s430_s0] sm:$0x3f]  ;;  %v399_v28 = vsub.s32 4, %v378_v15  ;;  %v404_v36 = vsub.s32 5, %v378_v15 }
   0x8   :  { %v42_v19 = vrot.slane %v26_v17, %v381_v16  ;;  %v52_v23 = vrot.slane %v26_v17, %v387_v18  ;;  %v62_v25 = vrot.slane %v26_v17, %v391_v20  ;;  %v72_v33 = vrot.slane %v26_v17, %v396_v26 }
   0x9   :  { %v82_v35 = vrot.slane %v26_v17, %v399_v28  ;;  %v92_v43 = vrot.slane %v26_v17, %v404_v36 }
   0xa   :  { %290 = vset.pattern.permute.xlu0 %v315_v5 }
   0xb   :  { %291 = vset.pattern.permute.xlu1 %v316_v6  ;;  %66 = vperm.xlu0 %290, %v27_v2  }
   0xc   :  { %76 = vperm.xlu1 %291, %v27_v2  }
   0xf   :  { %293 = vset.pattern.permute.xlu0 %v313_v1 }
  0x10   :  { %292 = vset.pattern.permute.xlu1 %v317_v8  ;;  %105 = vperm.xlu0 %293, %v96_v7  }
  0x11   :  { %86 = vperm.xlu1 %292, %v27_v2  }
  0x14   :  { %296 = vset.pattern.permute.xlu0 %v314_v4 }
  0x15   :  { %294 = vset.pattern.permute.xlu1 %v313_v1  ;;  %125 = vperm.xlu0 %296, %v96_v7  }
  0x16   :  { %100 = vperm.xlu1 %294, %v97_v9  }
  0x19   :  { %299 = vset.pattern.permute.xlu0 %v317_v8 }
  0x1a   :  { %295 = vset.pattern.permute.xlu1 %v312_v0  ;;  %155 = vperm.xlu0 %299, %v96_v7  }
  0x1b   :  { %115 = vperm.xlu1 %295, %v96_v7  }
  0x1e   :  { %302 = vset.pattern.permute.xlu0 %v313_v1 }
  0x1f   :  { %297 = vset.pattern.permute.xlu1 %v315_v5  ;;  %194 = vperm.xlu0 %302, %v185_v10  }
  0x20   :  { %135 = vperm.xlu1 %297, %v96_v7  }
  0x23   :  { %305 = vset.pattern.permute.xlu0 %v314_v4 }
  0x24   :  { %298 = vset.pattern.permute.xlu1 %v316_v6  ;;  %214 = vperm.xlu0 %305, %v185_v10  }
  0x25   :  { %145 = vperm.xlu1 %298, %v96_v7  }
  0x28   :  { %308 = vset.pattern.permute.xlu0 %v317_v8 }
  0x29   :  { %300 = vset.pattern.permute.xlu1 %v318_v11  ;;  %244 = vperm.xlu0 %308, %v185_v10  }
  0x2a   :  { %165 = vperm.xlu1 %300, %v96_v7  }
  0x2d   :  { %311 = vset.pattern.permute.xlu0 %v319_v12 }
  0x2e   :  { %301 = vset.pattern.permute.xlu1 %v319_v12 }
  0x2f   :  { %175 = vperm.xlu1 %301, %v96_v7  }
  0x33   :  { %303 = vset.pattern.permute.xlu1 %v313_v1 }
  0x34   :  { %189 = vperm.xlu1 %303, %v186_v13  }
  0x38   :  { %304 = vset.pattern.permute.xlu1 %v312_v0 }
  0x39   :  { %204 = vperm.xlu1 %304, %v185_v10  }
  0x3d   :  { %306 = vset.pattern.permute.xlu1 %v315_v5 }
  0x3e   :  { %224 = vperm.xlu1 %306, %v185_v10  }
  0x42   :  { %307 = vset.pattern.permute.xlu1 %v316_v6  ;;  %v170_v6 = vsub.s32 6, %v378_v15 }
  0x43   :  { %234 = vperm.xlu1 %307, %v185_v10  }
  0x47   :  { %309 = vset.pattern.permute.xlu1 %v318_v11 }
  0x48   :  { %254 = vperm.xlu1 %309, %v185_v10  }
  0x4c   :  { %310 = vset.pattern.permute.xlu1 %v319_v12  ;;  %v180_v12 = vsub.s32 7, %v378_v15 }
  0x4d   :  { %264 = vperm.xlu1 %310, %v185_v10  }
  0x81   :  { %v47_v21 = vpop.permute.xlu1 %46  ;;  %v37_v22 = vpop.permute.xlu0 %36 }
  0x82   :  { %v43_v24 = vmul.f32 %v42_v19, %v37_v22  ;;  %v53_v29 = vmul.f32 %v52_v23, %v47_v21 }
  0x85   :  { %v32_v27 = vpop.permute.xlu0 %31 }
  0x86   :  { %v44_v30 = vadd.f32 %v43_v24, %v32_v27  ;;  %v57_v31 = vpop.permute.xlu1 %56 }
  0x87   :  { %v63_v32 = vmul.f32 %v62_v25, %v57_v31 }
  0x88   :  { %v54_v34 = vadd.f32 %v53_v29, %v44_v30 }
  0x8a   :  { %v64_v37 = vadd.f32 %v63_v32, %v54_v34  ;;  %v67_v38 = vpop.permute.xlu0 %66 }
  0x8b   :  { %v73_v39 = vmul.f32 %v72_v33, %v67_v38  ;;  %v77_v40 = vpop.permute.xlu1 %76 }
  0x8c   :  { %v83_v42 = vmul.f32 %v82_v35, %v77_v40 }
  0x8d   :  { %v74_v41 = vadd.f32 %v73_v39, %v64_v37 }
  0x8f   :  { %v84_v45 = vadd.f32 %v83_v42, %v74_v41  ;;  %v106_v51 = vpop.permute.xlu0 %105 }
  0x90   :  { %v87_v44 = vpop.permute.xlu1 %86 }
  0x91   :  { %v93_v46 = vmul.f32 %v92_v43, %v87_v44 }
  0x93   :  { %v94_v47 = vadd.f32 %v93_v46, %v84_v45 }
  0x94   :  { %v126_v59 = vpop.permute.xlu0 %125 }
  0x95   :  { %v95_v48 = vmax.f32 %v94_v47, 0.0  ;;  %v101_v49 = vpop.permute.xlu1 %100 }
  0x97   :  { %v111_v50 = vrot.slane %v95_v48, %v381_v16  ;;  %v121_v53 = vrot.slane %v95_v48, %v387_v18  ;;  %v131_v56 = vrot.slane %v95_v48, %v391_v20  ;;  %v141_v62 = vrot.slane %v95_v48, %v396_v26 }
  0x98   :  { %v151_v1 = vrot.slane %v95_v48, %v399_v28  ;;  %v161_v3 = vrot.slane %v95_v48, %v404_v36  ;;  %v171_v11 = vrot.slane %v95_v48, %v170_v6  ;;  %v181_v17 = vrot.slane %v95_v48, %v180_v12 }
  0x99   :  { %v112_v52 = vmul.f32 %v111_v50, %v106_v51  ;;  %v132_v60 = vmul.f32 %v131_v56, %v126_v59  ;;  %v156_v7 = vpop.permute.xlu0 %155 }
  0x9a   :  { %v116_v54 = vpop.permute.xlu1 %115  ;;  %v162_v9 = vmul.f32 %v161_v3, %v156_v7 }
  0x9b   :  { %v113_v55 = vadd.f32 %v112_v52, %v101_v49  ;;  %v122_v57 = vmul.f32 %v121_v53, %v116_v54 }
  0x9d   :  { %v123_v58 = vadd.f32 %v122_v57, %v113_v55 }
  0x9e   :  { %v195_v29 = vpop.permute.xlu0 %194 }
  0x9f   :  { %v136_v61 = vpop.permute.xlu1 %135  ;;  %v133_v63 = vadd.f32 %v132_v60, %v123_v58 }
  0xa0   :  { %v142_v0 = vmul.f32 %v141_v62, %v136_v61 }
  0xa2   :  { %v143_v4 = vadd.f32 %v142_v0, %v133_v63 }
  0xa3   :  { %v215_v37 = vpop.permute.xlu0 %214 }
  0xa4   :  { %v146_v2 = vpop.permute.xlu1 %145 }
  0xa5   :  { %v152_v5 = vmul.f32 %v151_v1, %v146_v2 }
  0xa7   :  { %v153_v8 = vadd.f32 %v152_v5, %v143_v4 }
  0xa8   :  { %v245_v46 = vpop.permute.xlu0 %244 }
  0xa9   :  { %v166_v10 = vpop.permute.xlu1 %165  ;;  %v163_v13 = vadd.f32 %v162_v9, %v153_v8 }
  0xaa   :  { %v172_v14 = vmul.f32 %v171_v11, %v166_v10 }
  0xac   :  { %v173_v21 = vadd.f32 %v172_v14, %v163_v13 }
  0xae   :  { %v176_v19 = vpop.permute.xlu1 %175 }
  0xaf   :  { %v182_v22 = vmul.f32 %v181_v17, %v176_v19 }
  0xb1   :  { %v183_v23 = vadd.f32 %v182_v22, %v173_v21 }
  0xb3   :  { %v184_v24 = vmax.f32 %v183_v23, 0.0  ;;  %v190_v25 = vpop.permute.xlu1 %189 }
  0xb5   :  { %v200_v27 = vrot.slane %v184_v24, %v381_v16  ;;  %v210_v31 = vrot.slane %v184_v24, %v387_v18  ;;  %v220_v33 = vrot.slane %v184_v24, %v391_v20  ;;  %v230_v40 = vrot.slane %v184_v24, %v396_v26 }
  0xb6   :  { %v240_v43 = vrot.slane %v184_v24, %v399_v28  ;;  %v250_v44 = vrot.slane %v184_v24, %v404_v36  ;;  %v260_v49 = vrot.slane %v184_v24, %v170_v6  ;;  %v270_v52 = vrot.slane %v184_v24, %v180_v12 }
  0xb7   :  { %v201_v30 = vmul.f32 %v200_v27, %v195_v29  ;;  %v221_v38 = vmul.f32 %v220_v33, %v215_v37 }
  0xb8   :  { %v205_v32 = vpop.permute.xlu1 %204  ;;  %v251_v20 = vmul.f32 %v250_v44, %v245_v46 }
  0xb9   :  { %v202_v34 = vadd.f32 %v201_v30, %v190_v25  ;;  %v211_v15 = vmul.f32 %v210_v31, %v205_v32 }
  0xbb   :  { %v212_v35 = vadd.f32 %v211_v15, %v202_v34 }
  0xbd   :  { %v225_v39 = vpop.permute.xlu1 %224  ;;  %v222_v41 = vadd.f32 %v221_v38, %v212_v35 }
  0xbe   :  { %v231_v42 = vmul.f32 %v230_v40, %v225_v39 }
  0xc0   :  { %v232_v45 = vadd.f32 %v231_v42, %v222_v41 }
  0xc2   :  { %v235_v16 = vpop.permute.xlu1 %234 }
  0xc3   :  { %v241_v18 = vmul.f32 %v240_v43, %v235_v16 }
  0xc5   :  { %v242_v47 = vadd.f32 %v241_v18, %v232_v45 }
  0xc7   :  { %v255_v48 = vpop.permute.xlu1 %254  ;;  %v252_v50 = vadd.f32 %v251_v20, %v242_v47 }
  0xc8   :  { %v261_v51 = vmul.f32 %v260_v49, %v255_v48 }
  0xca   :  { %v262_v54 = vadd.f32 %v261_v51, %v252_v50 }
  0xcc   :  { %v265_v53 = vpop.permute.xlu1 %264 }
  0xcd   :  { %v271_v26 = vmul.f32 %v270_v52, %v265_v53 }
  0xcf   :  { %v272_v55 = vadd.f32 %v271_v26, %v262_v54 }
  0xd1   :  { %274 = vst.msk [vmem:[%s431_s7] sm:$0xf] %vm273_vm0, %v272_v55 }

</bundles_post_ra>
